<compile_context>
chip_gen: v7x
topology: tpu7x:2x2x1
jax: 0.10.0
libtpu: 0.0.40
codegen_flags: <defaults>
</compile_context>

<pallas_src>
import jax
import jax.numpy as jnp
from jax.experimental import pallas as pl
from jax.experimental.pallas import tpu as pltpu


def _round_up(x, m):
    return (x + m - 1) // m * m


def _patch_embed_kernel(p_ref, w_ref, b_ref, o_ref):
    # p_ref: (tm, Kp)  flattened-patch rows tile (streams over M)
    # w_ref: (Kp, Ep)  full projection weight (VMEM-resident, constant block)
    # b_ref: (1, Ep)   full bias, f32 (VMEM-resident)
    # o_ref: (tm, Ep)  output tile
    acc = jnp.dot(p_ref[...], w_ref[...], preferred_element_type=jnp.float32)
    o_ref[...] = (acc + b_ref[...]).astype(o_ref.dtype)


def _default_compute_dtype(x_dtype):
    """bf16 operands on v5e (bf16-native MXU); otherwise keep x.dtype."""
    try:
        kind = jax.devices()[0].device_kind.lower()
    except Exception:  # pragma: no cover - device query best-effort only
        kind = ""
    if ("v5e" in kind) or ("v5 lite" in kind) or ("v5litepod" in kind):
        return jnp.bfloat16
    return x_dtype


def patch_embed(x, weight, bias, patch_size, *, compute_dtype=None,
                out_dtype=None, tm_max=512):
    """x: (B, C, H, W) NCHW; weight: (E, C, p, p) (PyTorch Conv2d layout);
    bias: (E,).  Returns (B, num_patches, E).

    compute_dtype: MXU operand dtype (default: bf16 on v5e, else x.dtype);
                   accumulation and bias epilogue are always f32.
    out_dtype:     output dtype (default x.dtype); pass bf16 to halve the
                   dominant output HBM stream on a memory-bound op.
    """
    B, C, H, W = x.shape
    E = weight.shape[0]
    p = patch_size
    assert H % p == 0 and W % p == 0
    gh, gw = H // p, W // p
    N = gh * gw
    K = C * p * p
    M = B * N

    cdt = jnp.dtype(compute_dtype) if compute_dtype is not None \
        else jnp.dtype(_default_compute_dtype(x.dtype))
    odt = jnp.dtype(out_dtype) if out_dtype is not None else jnp.dtype(x.dtype)

    # Cast BEFORE the unfold so that if XLA materializes the patchified tensor
    # (fusion declined), it is already in the (possibly half-width) compute
    # dtype — layout-copy bytes halved for bf16.
    xs = x.astype(cdt)

    # Unfold into patches, flattened in (c, kh, kw) order to match Conv2d.
    patches = xs.reshape(B, C, gh, p, gw, p)
    patches = patches.transpose(0, 2, 4, 1, 3, 5)        # (B, gh, gw, C, p, p)
    patches = patches.reshape(M, K)                      # (B*N, K)
    # TODO(synk): profile whether fusing this unfold into the input DMA helps;
    # if the fused DMA degenerates into ~p*itemsize-byte strided reads, drop
    # allow_input_fusion for patches and let XLA materialize this tensor.

    # Conv2d weight (E, C, p, p) -> matmul weight (K, E); bias kept f32.
    w2d = weight.reshape(E, K).T.astype(cdt)
    b2d = bias.reshape(1, E).astype(jnp.float32)

    # Lane-dense padding: E -> Ep (output lanes), K -> Kp (input lanes /
    # weight sublanes).  Zero padding contributes nothing to the dot product.
    Ep = _round_up(E, 128)
    Kp = _round_up(K, 128)
    if Ep != E:
        w2d = jnp.pad(w2d, ((0, 0), (0, Ep - E)))
        b2d = jnp.pad(b2d, ((0, 0), (0, Ep - E)))
    if Kp != K:
        w2d = jnp.pad(w2d, ((0, Kp - K), (0, 0)))
        patches = jnp.pad(patches, ((0, 0), (0, Kp - K)))

    in_itm = jnp.dtype(cdt).itemsize
    out_itm = jnp.dtype(odt).itemsize
    # Sublane packing granularity for the M tile: 8 (f32), 16 (bf16), 32 (8-bit).
    sub_align = 8 * (4 // in_itm)

    # M tile: MXU-aligned (multiple of 256) at large M, >= 2 grid steps when
    # M allows (keeps both v7x TensorCores busy under "parallel" semantics).
    if M >= 1024 and tm_max >= 512:
        tm = 512
    elif M >= 512:
        tm = 256
    elif M > 2 * sub_align:
        tm = _round_up((M + 1) // 2, sub_align)          # >= 2 grid steps
    else:
        tm = _round_up(max(M, 1), sub_align)

    # Keep the VMEM footprint modest (v7x: 64 MiB physical, shared).
    def _vmem_est(tm_):
        return (2 * tm_ * Kp * in_itm          # patches (double-buffered)
                + 2 * Kp * Ep * in_itm         # resident weight (2 bufs alloc'd)
                + 2 * Ep * 4                   # resident bias
                + 2 * tm_ * Ep * out_itm)      # output tile
    while tm > sub_align and _vmem_est(tm) > (24 << 20):
        tm = max(sub_align, _round_up(tm // 2, sub_align))
    # TODO(synk): if Kp*Ep itself ever exceeds the VMEM budget (huge embed_dim),
    # fall back to tiling E; not needed for ViT-scale embeddings.

    Mp = _round_up(M, tm)
    if Mp != M:
        patches = jnp.pad(patches, ((0, Mp - M), (0, 0)))
    grid = (Mp // tm,)

    vmem_est = _vmem_est(tm)
    vmem_limit = int(min(max(2 * vmem_est, 8 << 20), 30 << 20))
    vmem_limit = max(vmem_limit, vmem_est + (2 << 20))

    out = pl.pallas_call(
        _patch_embed_kernel,
        out_shape=jax.ShapeDtypeStruct((Mp, Ep), odt),
        grid_spec=pltpu.PrefetchScalarGridSpec(
            num_scalar_prefetch=0,
            grid=grid,
            in_specs=[
                # Streaming patch rows.
                # TODO(synk): bump to pipeline_mode=pl.Buffered(3) if a profile
                # shows exposed input DMA with the resident weight.
                pl.BlockSpec((tm, Kp), lambda i: (i, 0)),
                # VMEM-resident weight & bias: constant block index -> DMA'd once.
                pl.BlockSpec((Kp, Ep), lambda i: (0, 0)),
                pl.BlockSpec((1, Ep), lambda i: (0, 0)),
            ],
            out_specs=pl.BlockSpec((tm, Ep), lambda i: (i, 0)),
        ),
        compiler_params=pltpu.CompilerParams(
            dimension_semantics=("parallel",),
            allow_input_fusion=[True, False, False],
            vmem_limit_bytes=vmem_limit,
        ),
    )(patches, w2d, b2d)

    return out[:M, :E].reshape(B, N, E)


if __name__ == "__main__":
    # Small shapes consistent with the module's forward:
    # img_size=16, patch_size=4, in_c=4, embed_dim=32, batch=2
    B, C, H, W = 2, 4, 16, 16
    patch_size = 4
    embed_dim = 32

    key = jax.random.PRNGKey(0)
    kx, kw, kb = jax.random.split(key, 3)
    x = jax.random.normal(kx, (B, C, H, W), dtype=jnp.float32)
    weight = jax.random.normal(
        kw, (embed_dim, C, patch_size, patch_size), dtype=jnp.float32) * 0.02
    bias = jax.random.normal(kb, (embed_dim,), dtype=jnp.float32) * 0.02

    fn = jax.jit(patch_embed, static_argnums=(3,),
                 static_argnames=("compute_dtype", "out_dtype"))

    # Exact f32-operand path (explicit, so the check is device-independent).
    out = jax.block_until_ready(
        fn(x, weight, bias, patch_size, compute_dtype=jnp.float32))

    # Reference: lax conv (same computation as nn.Conv2d forward).
    ref = jax.lax.conv_general_dilated(
        x, weight, window_strides=(patch_size, patch_size), padding="VALID",
        dimension_numbers=("NCHW", "OIHW", "NCHW"))
    ref = ref + bias[None, :, None, None]
    ref = ref.reshape(B, embed_dim, -1).transpose(0, 2, 1)  # flatten(2).transpose(1,2)

    N = (H // patch_size) * (W // patch_size)
    assert out.shape == (B, N, embed_dim)
    assert jnp.allclose(out, ref, atol=1e-4, rtol=1e-4)

    # bf16 MXU-operand fast path (default on v5e), f32 accumulation.
    out_bf16 = jax.block_until_ready(
        fn(x, weight, bias, patch_size, compute_dtype=jnp.bfloat16))
    assert out_bf16.shape == (B, N, embed_dim)
    assert jnp.allclose(out_bf16, ref, atol=5e-2, rtol=5e-2)

    # bf16 output stream option (halves the dominant output HBM traffic).
    out_bf16_out = jax.block_until_ready(
        fn(x, weight, bias, patch_size, compute_dtype=jnp.bfloat16,
           out_dtype=jnp.bfloat16))
    assert out_bf16_out.dtype == jnp.bfloat16
    assert jnp.allclose(out_bf16_out.astype(jnp.float32), ref,
                        atol=5e-2, rtol=5e-2)

    print("KERNEL_OK")
</pallas_src>

<mosaic_0001>
module attributes {stable_mosaic.version = 11 : i64} {
  func.func @_patch_embed_kernel(%arg0: i32, %arg1: memref<16x128xf32, #tpu.memory_space<vmem>>, %arg2: memref<128x128xf32, #tpu.memory_space<vmem>>, %arg3: memref<1x128xf32, #tpu.memory_space<vmem>>, %arg4: memref<16x128xf32, #tpu.memory_space<vmem>>) attributes {dimension_semantics = [#tpu.dimension_semantics<parallel>], iteration_bounds = array<i64: 2>, scalar_prefetch = 0 : i64, scratch_operands = 0 : i64, tpu.core_type = #tpu.core_type<tc>, window_params = [{transform_indices = @transform_0, window_bounds = array<i64: 16, 128>}, {pipeline_mode = #tpu.pipeline_mode<synchronous>, transform_indices = @transform_1, window_bounds = array<i64: 128, 128>}, {pipeline_mode = #tpu.pipeline_mode<synchronous>, transform_indices = @transform_2, window_bounds = array<i64: 1, 128>}, {transform_indices = @transform_3, window_bounds = array<i64: 16, 128>}]} {
    %c0 = arith.constant 0 : index
    %c0_0 = arith.constant 0 : index
    %0 = vector.load %arg1[%c0, %c0_0] : memref<16x128xf32, #tpu.memory_space<vmem>>, vector<16x128xf32>
    %c0_1 = arith.constant 0 : index
    %c0_2 = arith.constant 0 : index
    %1 = vector.load %arg2[%c0_1, %c0_2] : memref<128x128xf32, #tpu.memory_space<vmem>>, vector<128x128xf32>
    %cst = arith.constant dense<0.000000e+00> : vector<16x128xf32>
    %2 = tpu.matmul %0, %1, %cst {dimension_numbers = #tpu.dot_dimension_numbers<[1], [0], [0], [1], [0, 0, 1, 1], [], []>} : vector<16x128xf32>, vector<128x128xf32>, vector<16x128xf32> -> vector<16x128xf32>
    %c0_3 = arith.constant 0 : index
    %c0_4 = arith.constant 0 : index
    %3 = vector.load %arg3[%c0_3, %c0_4] : memref<1x128xf32, #tpu.memory_space<vmem>>, vector<1x128xf32>
    %4 = vector.broadcast %3 : vector<1x128xf32> to vector<16x128xf32>
    %5 = arith.addf %2, %4 : vector<16x128xf32>
    %c0_5 = arith.constant 0 : index
    %c0_6 = arith.constant 0 : index
    %6 = vector.load %arg4[%c0_5, %c0_6] : memref<16x128xf32, #tpu.memory_space<vmem>>, vector<16x128xf32>
    tpu.vector_store %arg4[%c0_5, %c0_6], %5 {strides = array<i32>} : memref<16x128xf32, #tpu.memory_space<vmem>>, vector<16x128xf32>,
    return
  }
  func.func @transform_0(%arg0: i32) -> (i32, i32) {
    %c0_i32 = arith.constant 0 : i32
    %c0_i32_0 = arith.constant 0 : i32
    return %arg0, %c0_i32 : i32, i32
  }
  func.func @transform_1(%arg0: i32) -> (i32, i32) {
    %c0_i32 = arith.constant 0 : i32
    %c0_i32_0 = arith.constant 0 : i32
    %c0_i32_1 = arith.constant 0 : i32
    return %c0_i32, %c0_i32_0 : i32, i32
  }
  func.func @transform_2(%arg0: i32) -> (i32, i32) {
    %c0_i32 = arith.constant 0 : i32
    %c0_i32_0 = arith.constant 0 : i32
    %c0_i32_1 = arith.constant 0 : i32
    return %c0_i32, %c0_i32_0 : i32, i32
  }
  func.func @transform_3(%arg0: i32) -> (i32, i32) {
    %c0_i32 = arith.constant 0 : i32
    %c0_i32_0 = arith.constant 0 : i32
    return %arg0, %c0_i32 : i32, i32
  }
}

</mosaic_0001>

<bundles_post_ra>
// kernel: patch_embed.2
= control target key start
LH: loop header
LB: loop body
LE: loop exit
PB: predicated region body
PF: predicated region fallthrough
CT: control target
= control target key end

     0   :  { %s769_s0 = inlined_call_operand.vmem [shape: f32[128,128], index: 0, kind: input, shape index: {}]   ;;  %s770_s1 = inlined_call_operand.vmem [shape: f32[1,128], index: 1, kind: input, shape index: {}]   ;;  %s771_s2 = inlined_call_operand.vmem [shape: f32[32,64], index: 2, kind: input, shape index: {}]   ;;  %s772_s3 = inlined_call_operand.<no memory space> [shape: f32[], index: 3, kind: input, shape index: {}]   ;;  %s773_s4 = inlined_call_operand.hbm [shape: f32[32,128], index: 4, kind: output, shape index: {}]  }
   0x1   :  { %v9_v0 = vstv %s772_s3 }
   0x2   :  { %10 = vsyncpa [#allocation8], 0 }
   0x3   :  { %12 = vsyncpa [#allocation8 + $0x1], 0  ;;  %s606_s17 = smov 0   ;;  %s608_s18 = smov 0  }
   0x4   :  { %s610_s19 = smov 0   ;;  %s612_s20 = smov 0  }
   0x5 LB: > { %s627_s21 = sadd.s32 4294967295, %s573_s20   ;;  %s370_s22 = sadd.s32 4294967294, %s573_s20   ;;  %s573_s20 = sphi %s612_s20, %s779_s20   ;;  %s569_s19 = sphi %s610_s19, %s778_s19   ;;  %s565_s18 = sphi %s608_s18, %s777_s18   ;;  %s561_s17 = sphi %s606_s17, %s776_s17  }
   0x6   : > { %s631_s23 = sadd.s32 1, %s573_s20   ;;  %s93_s24 = sadd.s32 1, %s569_s19 }
   0x7   : > { %s90_s25 = ssub.s32 %s573_s20, %s631_s23  ;;  %p103_p0 = scmp.ne.s32.totalorder %s569_s19, %s565_s18 }
   0x8   : > { %p91_p1 = scmp.eq.s32.totalorder %s90_s25, 0  ;;  %p104_p2 = scmp.eq.s32.totalorder %s627_s21, 1 }
   0x9   : > { %p109_p3 = scmp.ne.s32.totalorder %s565_s18, %s561_s17  ;;  %p110_p4 = scmp.eq.s32.totalorder %s370_s22, 1 }
   0xa   : > { %s642_s26 = scalar_select %p91_p1, %s569_s19, %s93_s24  }
   0xb   : > { %p644_p5 = por %p104_p2, %p103_p0  ;;  %p648_p6 = por %p110_p4, %p109_p3 }
   0xc   : > { %p373_p7 = scmp.ge.s32.totalorder %s573_s20, 1  ;;  %p143_p8 = scmp.lt.s32.totalorder %s573_s20, 3 }
   0xe   : > { %p144_p9 = pnand %p373_p7, %p143_p8 }
   0xf   : > { %v194_v1 = vld [vmem:[%s769_s0] sm:$0xff] (!%p144_p9)  ;;  %v195_v2 = vld [vmem:[%s769_s0 + $0x8] sm:$0xff] (!%p144_p9)  ;;  %v196_v3 = vld [vmem:[%s769_s0 + $0x10] sm:$0xff] (!%p144_p9)  ;;  %s375_s9 = sshll.u32 (!%p144_p9), %s627_s21, 1  ;;  %v175_v4 = vlaneseq (!%p144_p9)  ;;  %s164_s11 = sand.u32 (!%p144_p9), 1, %s565_s18  }
  0x10   : > { %147 = sbr.rel (%p144_p9) target bundleno = 280 (0x118), region = 32  ;;  %v438_v5 = vpack.c.bf16 (!%p144_p9), %v195_v2, %v194_v1  ;;  %v197_v6 = vld [vmem:[%s769_s0 + $0x18] sm:$0xff] (!%p144_p9)  ;;  %p168_p10 = scmp.lt.s32.totalorder (!%p144_p9), %s375_s9, 3  ;;  %v198_v8 = vld [vmem:[%s769_s0 + $0x20] sm:$0xff] (!%p144_p9)  ;;  %v199_v9 = vld [vmem:[%s769_s0 + $0x28] sm:$0xff] (!%p144_p9) }
  0x11   : > { %v442_v7 = vpack.c.bf16 (!%p144_p9), %v197_v6, %v196_v3  ;;  %v176_v10 = vand.u32 (!%p144_p9), 127, %v175_v4  ;;  %v446_v11 = vpack.c.bf16 (!%p144_p9), %v199_v9, %v198_v8  ;;  %v200_v12 = vld [vmem:[%s769_s0 + $0x30] sm:$0xff] (!%p144_p9)  ;;  %v201_v13 = vld [vmem:[%s769_s0 + $0x38] sm:$0xff] (!%p144_p9)  ;;  %v202_v17 = vld [vmem:[%s769_s0 + $0x40] sm:$0xff] (!%p144_p9)  ;;  %s374_s12 = sshll.u32 (!%p144_p9), %s164_s11, 4  ;;  %s384_s22 = sshll.u32 (!%p144_p9), %s627_s21, 8 }
  0x12   : > { %439 = vmatprep.subr.bf16.mxu0 (!%p144_p9), %v438_v5  ;;  %v450_v16 = vpack.c.bf16 (!%p144_p9), %v201_v13, %v200_v12  ;;  %v203_v18 = vld [vmem:[%s769_s0 + $0x48] sm:$0xff] (!%p144_p9)  ;;  %v204_v20 = vld [vmem:[%s769_s0 + $0x50] sm:$0xff] (!%p144_p9)  ;;  %v205_v21 = vld [vmem:[%s769_s0 + $0x58] sm:$0xff] (!%p144_p9)  ;;  %s166_s15 = scalar_lea.vmem (!%p144_p9), [#allocation7], %s374_s12  ;;  %s726_s25 = scalar_lea.hbm (!%p144_p9), %s773_s4, %s384_s22 }
  0x13   : > { %441 = vmatpush3.bf16.msra.mxu0 (!%p144_p9), %v438_v5  ;;  %vm178_vm0 = vcmp.lt.s32.totalorder (!%p144_p9), %v176_v10, 64  ;;  %v454_v19 = vpack.c.bf16 (!%p144_p9), %v203_v18, %v202_v17  ;;  %v458_v22 = vpack.c.bf16 (!%p144_p9), %v205_v21, %v204_v20  ;;  %v206_v23 = vld [vmem:[%s769_s0 + $0x60] sm:$0xff] (!%p144_p9)  ;;  %v207_v24 = vld [vmem:[%s769_s0 + $0x68] sm:$0xff] (!%p144_p9)  ;;  %v208_v26 = vld [vmem:[%s769_s0 + $0x70] sm:$0xff] (!%p144_p9)  ;;  %s728_s29 = scalar_lea.sflag (!%p144_p9), [#allocation8], %s164_s11  ;;  %s575_s21 = smov (!%p144_p9), [#allocation7]  }
  0x14   : > { %443 = vmatprep.subr.bf16.mxu0 (!%p144_p9), %v442_v7  ;;  %v462_v25 = vpack.c.bf16 (!%p144_p9), %v207_v24, %v206_v23  ;;  %v209_v27 = vld [vmem:[%s769_s0 + $0x78] sm:$0xff] (!%p144_p9)  ;;  %v378_v31 = vld [vmem:[%s770_s1] ss:$0 sm:$0xff] (!%p144_p9)  ;;  %s515_s5 = sshll.u32 (!%p144_p9), %s575_s21, 4  ;;  %s516_s5 = int_to_ptr.vmem [resolvable:$false] %s515_s5 }
  0x15   : > { %v466_v28 = vpack.c.bf16 (!%p144_p9), %v209_v27, %v208_v26  ;;  %s517_s7 = scalar_lea.vmem (!%p144_p9), %s516_s5, 512 }
  0x17   : > { %s781_s9 = smov (!%p168_p10, %s375_s9), 3  ;;  %445 = vmatpush3.bf16.msra.mxu0 %v442_v7 }
  0x18   : > { %s376_s16 = sshll.u32 %s781_s9, 3  ;;  %447 = vmatprep.subr.bf16.mxu0 %v446_v11 }
  0x19   : > { %s171_s6 = scalar_lea.vmem %s771_s2, %s376_s16  ;;  %s308_s16 = sshll.u32 %s166_s15, 4  ;;  %s721_s16 = int_to_ptr.vmem [resolvable:$true] %s308_s16 }
  0x1a   : > { %v174_v14 = vld [vmem:[%s171_s6] sm:$0xff]  ;;  %v377_v29 = vld [vmem:[%s171_s6 + $0x8] sm:$0xff]  ;;  %s511_s30 = scalar_lea.vmem %s721_s16, 256  ;;  %p518_p0 = scmp.lt.s32.totalorder %s721_s16, %s516_s5 }
  0x1b   : > { %v179_v15 = vsel %vm178_vm0, %v174_v14, %v9_v0  ;;  %449 = vmatpush3.bf16.msra.mxu0 %v446_v11  ;;  %v188_v30 = vsel %vm178_vm0, %v377_v29, %v9_v0  ;;  %p512_p11 = scmp.ne.s32.totalorder %s721_s16, %s511_s30  ;;  %p519_p1 = scmp.lt.s32.totalorder %s517_s7, %s511_s30 }
  0x1c   : > { %435 = vmatprep.mubr.f32.mxu0 %v179_v15  ;;  %451 = vmatprep.subr.bf16.mxu0 %v450_v16 }
  0x1d   : > { %p513_p12 = pnand %p512_p11, %p644_p5  ;;  %p520_p2 = por %p519_p1, %p518_p0 }
  0x1f   : > { %453 = vmatpush3.bf16.msra.mxu0 %v450_v16  ;;  %p514_p13 = pneg %p513_p12 }
  0x20   : > { %455 = vmatprep.subr.bf16.mxu0 %v454_v19 }
  0x21   : > { %p521_p3 = pnand %p520_p2, %p514_p13 }
  0x23   : > { %457 = vmatpush3.bf16.msra.mxu0 %v454_v19 }
  0x24   : > { %459 = vmatprep.subr.bf16.mxu0 %v458_v22 }
  0x27   : > { %461 = vmatpush3.bf16.msra.mxu0 %v458_v22 }
  0x28   : > { %463 = vmatprep.subr.bf16.mxu0 %v462_v25 }
  0x2b   : > { %465 = vmatpush3.bf16.msra.mxu0 %v462_v25 }
  0x2c   : > { %467 = vmatprep.subr.bf16.mxu0 %v466_v28 }
  0x2f   : > { %469 = vmatpush3.bf16.msra.mxu0 %v466_v28 }
  0x32   : > { %436 = vmatmul.mubr.f32.vlgmr.msra.gmra.mrb[0].mxu0 %v188_v30 }
 0x105   : > { %v437_v32 = vpop.f32.mrb[0].mxu0 }
 0x106   : > { %v289_v33 = vadd.f32 %v437_v32, %v378_v31  ;;  %v283_v34 = vpop.f32.mrb[1].mxu0 }
 0x107   : > { %v284_v35 = vadd.f32 %v378_v31, %v283_v34 }
 0x108   : > { %293 = vst [vmem:[%s166_s15 + $0x8] sm:$0xff] %v289_v33 }
 0x109   : > { %292 = vst [vmem:[%s166_s15] sm:$0xff] %v284_v35 }
 0x10a   : > { %524 = shalt.err (!%p521_p3)
}
 0x10b   : > { %s525_s8 = scalar_lea.hbm %s726_s25, 256  ;;  %s529_s11 = scalar_lea.hbm %s773_s4, 512 }
 0x10c   : > { %p526_p4 = scmp.ne.s32.totalorder %s726_s25, %s525_s8  ;;  %p530_p9 = scmp.lt.u32.totalorder %s726_s25, %s773_s4 }
 0x10d   : > { %p531_p10 = scmp.lt.u32.totalorder %s529_s11, %s525_s8  ;;  %p533_p12 = scmp.lt.u32.totalorder %s525_s8, %s726_s25 }
 0x10e   : > { %p527_p7 = pnand %p526_p4, %p644_p5 }
 0x10f   : > { %p532_p11 = por %p531_p10, %p530_p9 }
 0x110   : > { %p528_p8 = pneg %p527_p7 }
 0x111   : > { %p534_p13 = por %p533_p12, %p532_p11 }
 0x113   : > { %p535_p0 = pnand %p534_p13, %p528_p8 }
 0x115   : > { %538 = shalt.err (!%p535_p0)
}
 0x116   : > { %s576_s14 = smov 128   ;;  %s577_s15 = smov 8  }
 0x117   : > { %470 = dma.vmem_to_hbm [thread:$0]  (%p644_p5), %s721_s16, 256, %s726_s25, %s728_s29, %s576_s14, %s576_s14, %s577_s15  }
 0x118 PF: > { %p476_p1 = scmp.ge.s32.totalorder %s573_s20, 2  ;;  %s323_s22 = sand.u32 1, %s561_s17  }
 0x119   : > { %s324_s6 = scalar_lea.sflag [#allocation8], %s323_s22 }
 0x11a   : > { %p473_p2 = pnand %p476_p1, %p648_p6 }
 0x11c   : > { %556 = dma.done.wait (!%p473_p2), %s324_s6, 256  }
 0x11d   : > { %558 = vsyncadd (!%p473_p2), %s324_s6, 4294967040  ;;  %p15_p3 = scmp.ge.s32.totalorder %s631_s23, 4   ;;  %s776_s17 = smov %s565_s18 }
 0x11e   : > { %s777_s18 = smov %s569_s19  ;;  %s778_s19 = smov %s642_s26 }
 0x11f   : > { %s779_s20 = smov %s631_s23  ;;  %17 = sbr.rel (!%p15_p3) target bundleno = 5 (0x5), region = 69 }
 0x126   :  { %329 = vsyncpa [#allocation8], 1 }
 0x127   :  { %331 = vsyncpa [#allocation8 + $0x1], 1 }

</bundles_post_ra>
